<compile_context>
chip_gen: v7x
topology: tpu7x:2x2x1
jax: 0.10.0
libtpu: 0.0.40
codegen_flags: <defaults>
</compile_context>

<pallas_src>
import math

import jax
import jax.numpy as jnp
from jax.experimental import pallas as pl
from jax.experimental.pallas import tpu as pltpu


def _dma_copy_kernel(x_hbm_ref, o_hbm_ref, copy_sem):
    # One whole-array HBM->HBM DMA: no VMEM staging, no grid, no relayout.
    cp = pltpu.make_async_copy(x_hbm_ref, o_hbm_ref, copy_sem)
    cp.start()
    cp.wait()


@jax.jit
def _pallas_flatten_copy(x2d: jax.Array) -> jax.Array:
    size_bytes = x2d.size * jnp.dtype(x2d.dtype).itemsize
    return pl.pallas_call(
        _dma_copy_kernel,
        out_shape=jax.ShapeDtypeStruct(x2d.shape, x2d.dtype),
        in_specs=[pl.BlockSpec(memory_space=pl.ANY)],
        out_specs=pl.BlockSpec(memory_space=pl.ANY),
        scratch_shapes=[pltpu.SemaphoreType.DMA],
        cost_estimate=pl.CostEstimate(
            flops=0, transcendentals=0, bytes_accessed=2 * size_bytes
        ),
    )(x2d)


def flatten_layer(x: jax.Array, *, need_fusion_site: bool = False) -> jax.Array:
    """Pallas equivalent of FlattenLayer.forward: (B, ...) -> (B, prod(...)).

    Default: metadata-only reshape (optimal -- zero HBM traffic).
    need_fusion_site=True: route through the Pallas HBM->HBM DMA kernel for
    callers that need a materialized copy / custom-call fusion site.
    """
    B = x.shape[0]
    flat = math.prod(x.shape[1:]) if x.ndim > 1 else 1
    x2d = x.reshape(B, flat)          # free metadata reshape in the wrapper
    if not need_fusion_site:
        return x2d
    return _pallas_flatten_copy(x2d)


if __name__ == "__main__":
    key = jax.random.PRNGKey(0)
    # Small NCHW input consistent with a conv-style feature map.
    x = jax.random.normal(key, (2, 4, 16, 16), dtype=jnp.float32)

    ref = x.reshape(x.shape[0], -1)   # same semantics as torch .view(B, -1)

    # Fast (default) path: pure reshape.
    fast = jax.block_until_ready(flatten_layer(x))
    assert fast.shape == (2, 4 * 16 * 16)
    assert bool(jnp.array_equal(fast, ref))

    # Pallas path: single HBM->HBM DMA copy kernel.
    out = jax.block_until_ready(flatten_layer(x, need_fusion_site=True))
    assert out.shape == (2, 4 * 16 * 16)
    assert out.dtype == x.dtype
    assert bool(jnp.array_equal(out, ref))

    print("KERNEL_OK")
</pallas_src>

<mosaic_0001>
module attributes {stable_mosaic.version = 11 : i64} {
  func.func @_dma_copy_kernel(%arg0: memref<2x1024xf32, #tpu.memory_space<any>>, %arg1: memref<2x1024xf32, #tpu.memory_space<any>>, %arg2: memref<!tpu.dma_semaphore, #tpu.memory_space<semaphore_mem>>) attributes {dimension_semantics = [], scalar_prefetch = 0 : i64, scratch_operands = 1 : i64, tpu.core_type = #tpu.core_type<tc>} {
    tpu.enqueue_dma source(%arg0 : memref<2x1024xf32, #tpu.memory_space<any>>) target(%arg1 : memref<2x1024xf32, #tpu.memory_space<any>>) target_semaphore(%arg2 : memref<!tpu.dma_semaphore, #tpu.memory_space<semaphore_mem>>)
    tpu.wait_dma2 semaphore(%arg2 : memref<!tpu.dma_semaphore, #tpu.memory_space<semaphore_mem>>) src(%arg0 : memref<2x1024xf32, #tpu.memory_space<any>>) dst(%arg1 : memref<2x1024xf32, #tpu.memory_space<any>>)
    return
  }
}

</mosaic_0001>

<bundles_post_ra>
// kernel: _pallas_flatten_copy.1
= control target key start
LH: loop header
LB: loop body
LE: loop exit
PB: predicated region body
PF: predicated region fallthrough
CT: control target
= control target key end

     0   :  { %s35_s6 = smov [#allocation2]   ;;  %s36_s7 = smov [#allocation3]   ;;  %s54_s0 = inlined_call_operand.hbm [shape: f32[2,1024], index: 0, kind: input, shape index: {}]   ;;  %s55_s1 = inlined_call_operand.hbm [shape: f32[2,1024], index: 1, kind: output, shape index: {}]  }
   0x1   :  { %s37_s8 = smov 0  }
   0x2   :  { %18 = dma.general %s54_s0, 256, %s55_s1, %s35_s6, %s36_s7, [#allocation4], %s37_s8, 0  }
   0x3   :  { %33 = dma.done.wait [#allocation2], 256 }
   0x4   :  { %34 = vsyncadd [#allocation2], 4294967040 }
   0x5   :  { %23 = vsyncmov [#allocation2] }
   0x8   :  { %s24_s13 = vpop.sfrf %23 }
   0x9   :  { %p29_p0 = scmp.ne.s32.totalorder %s24_s13, 0 }
   0xb   :  { %28 = shalt.err (%p29_p0)  }

</bundles_post_ra>
